<compile_context>
chip_gen: v6e
topology: v6e:2x2x1
jax: 0.10.0
libtpu: 0.0.40
codegen_flags: <defaults>
</compile_context>

<pallas_src>
import functools

import jax
import jax.numpy as jnp
from jax.experimental import pallas as pl
from jax.experimental.pallas import tpu as pltpu


# -----------------------------------------------------------------------------
# Helpers.
# -----------------------------------------------------------------------------
def _round_up(x, m):
    return ((x + m - 1) // m) * m


def _pad_axis(a, axis, target):
    pad = target - a.shape[axis]
    if pad == 0:
        return a
    widths = [(0, 0)] * a.ndim
    widths[axis] = (0, pad)
    return jnp.pad(a, widths)


# -----------------------------------------------------------------------------
# Pallas kernel: full DCNv2 forward for one batch tile.
# -----------------------------------------------------------------------------
def _dcnv2_kernel(n_cross, n_deep, *refs):
    # refs layout: x, (cross_w, cross_b)*n_cross, (deep_w, deep_b)*n_deep,
    #              head_w, head_b, out
    it = iter(refs)
    x_ref = next(it)
    cross = [(next(it), next(it)) for _ in range(n_cross)]
    deep = [(next(it), next(it)) for _ in range(n_deep)]
    head_w_ref = next(it)
    head_b_ref = next(it)
    o_ref = next(it)

    # x0 / elementwise math kept in f32 (VPU); MXU operands downcast to bf16
    # with f32 accumulation.
    x0 = x_ref[...].astype(jnp.float32)
    x = x0
    # Cross network: x_{l+1} = x0 * (W_l x_l + b_l)
    for w_ref, b_ref in cross:
        xw = jnp.dot(x.astype(jnp.bfloat16), w_ref[...],
                     preferred_element_type=jnp.float32)
        x = x0 * (xw + b_ref[...])

    # Deep network: Linear -> ReLU -> Dropout(identity at inference)
    h = x
    for w_ref, b_ref in deep:
        h = jnp.dot(h.astype(jnp.bfloat16), w_ref[...],
                    preferred_element_type=jnp.float32) + b_ref[...]
        h = jnp.maximum(h, 0.0)
        # TODO(synk): Dropout omitted (inference/eval semantics => identity).

    out = jnp.dot(h.astype(jnp.bfloat16), head_w_ref[...],
                  preferred_element_type=jnp.float32) + head_b_ref[...]
    o_ref[...] = out.astype(o_ref.dtype)


def dcnv2_forward(x, cross_params, deep_params, head_w, head_b, *, tb=None):
    """Run the DCNv2 backbone (cross + deep + head) inside a Pallas kernel.

    x            : [B, d_in] float32
    cross_params : list of (W [d_in, d_in], b [1, d_in])
    deep_params  : list of (W [d_prev, d_deep], b [1, d_deep])
    head_w       : [d_deep, d_out], head_b: [1, d_out]
    """
    B, d_in = x.shape
    d_deep = deep_params[0][0].shape[1]
    d_out = head_w.shape[1]
    n_cross = len(cross_params)
    n_deep = len(deep_params)

    LANE = 128
    d_in_p = _round_up(d_in, LANE)
    d_deep_p = _round_up(d_deep, LANE)
    d_out_p = _round_up(d_out, LANE)

    # Batch tile: large tiles amortize per-grid-step overhead; keep >= 2 grid
    # steps when possible so v7x megacore has work for both cores.
    if tb is None:
        tb = min(512, _round_up(B, 8))
        if B > 8 and pl.cdiv(B, tb) < 2:
            tb = _round_up(pl.cdiv(B, 2), 8)
    tb = max(8, _round_up(min(tb, B), 8))
    B_p = _round_up(B, tb)
    grid = (B_p // tb,)

    # Zero-pad to lane-friendly sizes; keep x + weights in bf16 (halves DMA),
    # biases stay f32 (added on the VPU after the f32 MXU accumulate).
    x_p = _pad_axis(_pad_axis(x, 1, d_in_p), 0, B_p).astype(jnp.bfloat16)

    def pad_wb(w, b, rows, cols):
        wp = _pad_axis(_pad_axis(w, 0, rows), 1, cols).astype(jnp.bfloat16)
        bp = _pad_axis(b, 1, cols).astype(jnp.float32)
        return wp, bp

    cross_p = [pad_wb(w, b, d_in_p, d_in_p) for w, b in cross_params]
    deep_p = []
    prev = d_in_p
    for w, b in deep_params:
        deep_p.append(pad_wb(w, b, prev, d_deep_p))
        prev = d_deep_p
    head_w_p, head_b_p = pad_wb(head_w, head_b, d_deep_p, d_out_p)

    # Constant weights/biases: whole-array VMEM operands (no grid blocking,
    # no double buffering / re-fetch across batch tiles).
    vmem_whole = pl.BlockSpec(memory_space=pltpu.MemorySpace.VMEM)

    args = [x_p]
    in_specs = [pl.BlockSpec((tb, d_in_p), lambda i: (i, 0))]
    for w, b in list(cross_p) + list(deep_p):
        args += [w, b]
        in_specs += [vmem_whole, vmem_whole]
    args += [head_w_p, head_b_p]
    in_specs += [vmem_whole, vmem_whole]

    # Advisory cost estimate (helps XLA schedule surrounding gather/concat).
    flops = 2 * B_p * (
        n_cross * d_in_p * d_in_p
        + d_in_p * d_deep_p
        + max(n_deep - 1, 0) * d_deep_p * d_deep_p
        + d_deep_p * d_out_p
    )
    bytes_accessed = sum(int(a.size) * a.dtype.itemsize for a in args)
    bytes_accessed += B_p * d_out_p * 4  # f32 output

    kernel = functools.partial(_dcnv2_kernel, n_cross, n_deep)
    out_p = pl.pallas_call(
        kernel,
        out_shape=jax.ShapeDtypeStruct((B_p, d_out_p), jnp.float32),
        grid=grid,
        in_specs=in_specs,
        out_specs=pl.BlockSpec((tb, d_out_p), lambda i: (i, 0)),
        compiler_params=pltpu.CompilerParams(
            dimension_semantics=("parallel",),
            vmem_limit_bytes=32 * 1024 * 1024,
        ),
        cost_estimate=pl.CostEstimate(
            flops=int(flops),
            transcendentals=0,
            bytes_accessed=int(bytes_accessed),
        ),
    )(*args)
    # Slice back the padded batch rows / padded output lanes.
    return out_p[:B, :d_out]


# -----------------------------------------------------------------------------
# Plain-JAX glue: feature assembly (matches Model.forward for the flat/DCNv2
# case with m_num=None, m_bin=None, CategoricalEmbeddings1d for x_cat).
# -----------------------------------------------------------------------------
def assemble_features(x_num, x_bin, x_cat, cat_emb_tables):
    # cat_emb_tables: list of [cardinality, d_cat_emb]
    cat_parts = [
        jnp.take(tbl, x_cat[:, j], axis=0) for j, tbl in enumerate(cat_emb_tables)
    ]  # each [B, d_cat_emb]
    cat_flat = jnp.concatenate(cat_parts, axis=-1)  # == emb(x_cat).flatten(-2)
    return jnp.concatenate([x_num, x_bin, cat_flat], axis=-1)


# -----------------------------------------------------------------------------
# Pure-JAX reference (emulates the kernel's bf16-operand / f32-accumulate
# numerics for the correctness check).
# -----------------------------------------------------------------------------
def dcnv2_reference(x, cross_params, deep_params, head_w, head_b):
    def bdot(a, w):
        return jnp.dot(a.astype(jnp.bfloat16), w.astype(jnp.bfloat16),
                       preferred_element_type=jnp.float32)

    x0 = x.astype(jnp.bfloat16).astype(jnp.float32)
    h = x0
    for w, b in cross_params:
        h = x0 * (bdot(h, w) + b)
    for w, b in deep_params:
        h = jnp.maximum(bdot(h, w) + b, 0.0)
    return bdot(h, head_w) + head_b


# -----------------------------------------------------------------------------
# Deterministic parameter construction.
# -----------------------------------------------------------------------------
def init_params(key, d_in, d_deep, d_out, n_cross, n_deep, cat_cards, d_cat_emb):
    keys = iter(jax.random.split(key, 3 * n_cross + 3 * n_deep + 4 + len(cat_cards)))

    cross_params = []
    for _ in range(n_cross):
        w = 0.1 * jax.random.normal(next(keys), (d_in, d_in), jnp.float32)
        b = jnp.zeros((1, d_in), jnp.float32)  # torch.nn.init.zeros_(m.bias)
        cross_params.append((w, b))

    deep_params = []
    d_prev = d_in
    for _ in range(n_deep):
        w = 0.1 * jax.random.normal(next(keys), (d_prev, d_deep), jnp.float32)
        b = 0.01 * jax.random.normal(next(keys), (1, d_deep), jnp.float32)
        deep_params.append((w, b))
        d_prev = d_deep

    head_w = 0.1 * jax.random.normal(next(keys), (d_deep, d_out), jnp.float32)
    head_b = 0.01 * jax.random.normal(next(keys), (1, d_out), jnp.float32)

    cat_emb_tables = [
        0.1 * jax.random.normal(next(keys), (card, d_cat_emb), jnp.float32)
        for card in cat_cards
    ]
    return cross_params, deep_params, head_w, head_b, cat_emb_tables


if __name__ == "__main__":
    # Small, module-consistent shapes (batch large enough for 2 grid steps).
    B = 256
    n_num_features = 8
    n_bin_features = 4
    cat_cardinalities = [5, 7, 11]
    d_cat_embedding = 4
    d_in = n_num_features + n_bin_features + len(cat_cardinalities) * d_cat_embedding
    d_deep = 32
    n_classes = 3
    d_out = n_classes
    n_cross_layers = 2
    n_deep_layers = 2

    key = jax.random.PRNGKey(0)
    k_x, k_b, k_c, k_p = jax.random.split(key, 4)

    x_num = jax.random.normal(k_x, (B, n_num_features), jnp.float32)
    x_bin = jax.random.bernoulli(k_b, 0.5, (B, n_bin_features)).astype(jnp.float32)
    x_cat = jnp.stack(
        [
            jax.random.randint(jax.random.fold_in(k_c, j), (B,), 0, card)
            for j, card in enumerate(cat_cardinalities)
        ],
        axis=-1,
    )

    cross_params, deep_params, head_w, head_b, cat_tables = init_params(
        k_p, d_in, d_deep, d_out, n_cross_layers, n_deep_layers,
        cat_cardinalities, d_cat_embedding,
    )

    # Feature assembly (glue) + DCNv2 backbone (Pallas kernel).
    x = assemble_features(x_num, x_bin, x_cat, cat_tables)
    out = dcnv2_forward(x, cross_params, deep_params, head_w, head_b)
    out = jax.block_until_ready(out)

    ref = dcnv2_reference(x, cross_params, deep_params, head_w, head_b)
    assert out.shape == (B, d_out), out.shape
    assert jnp.allclose(out, ref, atol=1e-3, rtol=1e-3), (
        float(jnp.max(jnp.abs(out - ref)))
    )
    print("KERNEL_OK")
</pallas_src>

<mosaic_0001>
module attributes {stable_mosaic.version = 11 : i64} {
  func.func @_dcnv2_kernel(%arg0: i32, %arg1: memref<128x128xbf16, #tpu.memory_space<vmem>>, %arg2: memref<128x128xbf16, #tpu.memory_space<vmem>>, %arg3: memref<1x128xf32, #tpu.memory_space<vmem>>, %arg4: memref<128x128xbf16, #tpu.memory_space<vmem>>, %arg5: memref<1x128xf32, #tpu.memory_space<vmem>>, %arg6: memref<128x128xbf16, #tpu.memory_space<vmem>>, %arg7: memref<1x128xf32, #tpu.memory_space<vmem>>, %arg8: memref<128x128xbf16, #tpu.memory_space<vmem>>, %arg9: memref<1x128xf32, #tpu.memory_space<vmem>>, %arg10: memref<128x128xbf16, #tpu.memory_space<vmem>>, %arg11: memref<1x128xf32, #tpu.memory_space<vmem>>, %arg12: memref<128x128xf32, #tpu.memory_space<vmem>>) attributes {dimension_semantics = [#tpu.dimension_semantics<parallel>], iteration_bounds = array<i64: 2>, scalar_prefetch = 0 : i64, scratch_operands = 0 : i64, tpu.core_type = #tpu.core_type<tc>, window_params = [{transform_indices = @transform_0, window_bounds = array<i64: 128, 128>}, {pipeline_mode = #tpu.pipeline_mode<synchronous>, transform_indices = @transform_1, window_bounds = array<i64: 128, 128>}, {pipeline_mode = #tpu.pipeline_mode<synchronous>, transform_indices = @transform_2, window_bounds = array<i64: 1, 128>}, {pipeline_mode = #tpu.pipeline_mode<synchronous>, transform_indices = @transform_3, window_bounds = array<i64: 128, 128>}, {pipeline_mode = #tpu.pipeline_mode<synchronous>, transform_indices = @transform_4, window_bounds = array<i64: 1, 128>}, {pipeline_mode = #tpu.pipeline_mode<synchronous>, transform_indices = @transform_5, window_bounds = array<i64: 128, 128>}, {pipeline_mode = #tpu.pipeline_mode<synchronous>, transform_indices = @transform_6, window_bounds = array<i64: 1, 128>}, {pipeline_mode = #tpu.pipeline_mode<synchronous>, transform_indices = @transform_7, window_bounds = array<i64: 128, 128>}, {pipeline_mode = #tpu.pipeline_mode<synchronous>, transform_indices = @transform_8, window_bounds = array<i64: 1, 128>}, {pipeline_mode = #tpu.pipeline_mode<synchronous>, transform_indices = @transform_9, window_bounds = array<i64: 128, 128>}, {pipeline_mode = #tpu.pipeline_mode<synchronous>, transform_indices = @transform_10, window_bounds = array<i64: 1, 128>}, {transform_indices = @transform_11, window_bounds = array<i64: 128, 128>}]} {
    %c0 = arith.constant 0 : index
    %c0_0 = arith.constant 0 : index
    %0 = vector.load %arg1[%c0, %c0_0] : memref<128x128xbf16, #tpu.memory_space<vmem>>, vector<128x128xbf16>
    %1 = arith.extf %0 : vector<128x128xbf16> to vector<128x128xf32>
    %2 = arith.truncf %1 : vector<128x128xf32> to vector<128x128xbf16>
    %c0_1 = arith.constant 0 : index
    %c0_2 = arith.constant 0 : index
    %3 = vector.load %arg2[%c0_1, %c0_2] : memref<128x128xbf16, #tpu.memory_space<vmem>>, vector<128x128xbf16>
    %cst = arith.constant dense<0.000000e+00> : vector<128x128xf32>
    %4 = tpu.matmul %2, %3, %cst {dimension_numbers = #tpu.dot_dimension_numbers<[1], [0], [0], [1], [0, 0, 1, 1], [], []>} : vector<128x128xbf16>, vector<128x128xbf16>, vector<128x128xf32> -> vector<128x128xf32>
    %c0_3 = arith.constant 0 : index
    %c0_4 = arith.constant 0 : index
    %5 = vector.load %arg3[%c0_3, %c0_4] : memref<1x128xf32, #tpu.memory_space<vmem>>, vector<1x128xf32>
    %6 = vector.broadcast %5 : vector<1x128xf32> to vector<128x128xf32>
    %7 = arith.addf %4, %6 : vector<128x128xf32>
    %8 = arith.mulf %1, %7 : vector<128x128xf32>
    %9 = arith.truncf %8 : vector<128x128xf32> to vector<128x128xbf16>
    %c0_5 = arith.constant 0 : index
    %c0_6 = arith.constant 0 : index
    %10 = vector.load %arg4[%c0_5, %c0_6] : memref<128x128xbf16, #tpu.memory_space<vmem>>, vector<128x128xbf16>
    %cst_7 = arith.constant dense<0.000000e+00> : vector<128x128xf32>
    %11 = tpu.matmul %9, %10, %cst_7 {dimension_numbers = #tpu.dot_dimension_numbers<[1], [0], [0], [1], [0, 0, 1, 1], [], []>} : vector<128x128xbf16>, vector<128x128xbf16>, vector<128x128xf32> -> vector<128x128xf32>
    %c0_8 = arith.constant 0 : index
    %c0_9 = arith.constant 0 : index
    %12 = vector.load %arg5[%c0_8, %c0_9] : memref<1x128xf32, #tpu.memory_space<vmem>>, vector<1x128xf32>
    %13 = vector.broadcast %12 : vector<1x128xf32> to vector<128x128xf32>
    %14 = arith.addf %11, %13 : vector<128x128xf32>
    %15 = arith.mulf %1, %14 : vector<128x128xf32>
    %16 = arith.truncf %15 : vector<128x128xf32> to vector<128x128xbf16>
    %c0_10 = arith.constant 0 : index
    %c0_11 = arith.constant 0 : index
    %17 = vector.load %arg6[%c0_10, %c0_11] : memref<128x128xbf16, #tpu.memory_space<vmem>>, vector<128x128xbf16>
    %cst_12 = arith.constant dense<0.000000e+00> : vector<128x128xf32>
    %18 = tpu.matmul %16, %17, %cst_12 {dimension_numbers = #tpu.dot_dimension_numbers<[1], [0], [0], [1], [0, 0, 1, 1], [], []>} : vector<128x128xbf16>, vector<128x128xbf16>, vector<128x128xf32> -> vector<128x128xf32>
    %c0_13 = arith.constant 0 : index
    %c0_14 = arith.constant 0 : index
    %19 = vector.load %arg7[%c0_13, %c0_14] : memref<1x128xf32, #tpu.memory_space<vmem>>, vector<1x128xf32>
    %20 = vector.broadcast %19 : vector<1x128xf32> to vector<128x128xf32>
    %21 = arith.addf %18, %20 : vector<128x128xf32>
    %cst_15 = arith.constant 0.000000e+00 : f32
    %22 = vector.broadcast %cst_15 : f32 to vector<128x128xf32>
    %23 = arith.maximumf %21, %22 : vector<128x128xf32>
    %24 = arith.truncf %23 : vector<128x128xf32> to vector<128x128xbf16>
    %c0_16 = arith.constant 0 : index
    %c0_17 = arith.constant 0 : index
    %25 = vector.load %arg8[%c0_16, %c0_17] : memref<128x128xbf16, #tpu.memory_space<vmem>>, vector<128x128xbf16>
    %cst_18 = arith.constant dense<0.000000e+00> : vector<128x128xf32>
    %26 = tpu.matmul %24, %25, %cst_18 {dimension_numbers = #tpu.dot_dimension_numbers<[1], [0], [0], [1], [0, 0, 1, 1], [], []>} : vector<128x128xbf16>, vector<128x128xbf16>, vector<128x128xf32> -> vector<128x128xf32>
    %c0_19 = arith.constant 0 : index
    %c0_20 = arith.constant 0 : index
    %27 = vector.load %arg9[%c0_19, %c0_20] : memref<1x128xf32, #tpu.memory_space<vmem>>, vector<1x128xf32>
    %28 = vector.broadcast %27 : vector<1x128xf32> to vector<128x128xf32>
    %29 = arith.addf %26, %28 : vector<128x128xf32>
    %cst_21 = arith.constant 0.000000e+00 : f32
    %30 = vector.broadcast %cst_21 : f32 to vector<128x128xf32>
    %31 = arith.maximumf %29, %30 : vector<128x128xf32>
    %32 = arith.truncf %31 : vector<128x128xf32> to vector<128x128xbf16>
    %c0_22 = arith.constant 0 : index
    %c0_23 = arith.constant 0 : index
    %33 = vector.load %arg10[%c0_22, %c0_23] : memref<128x128xbf16, #tpu.memory_space<vmem>>, vector<128x128xbf16>
    %cst_24 = arith.constant dense<0.000000e+00> : vector<128x128xf32>
    %34 = tpu.matmul %32, %33, %cst_24 {dimension_numbers = #tpu.dot_dimension_numbers<[1], [0], [0], [1], [0, 0, 1, 1], [], []>} : vector<128x128xbf16>, vector<128x128xbf16>, vector<128x128xf32> -> vector<128x128xf32>
    %c0_25 = arith.constant 0 : index
    %c0_26 = arith.constant 0 : index
    %35 = vector.load %arg11[%c0_25, %c0_26] : memref<1x128xf32, #tpu.memory_space<vmem>>, vector<1x128xf32>
    %36 = vector.broadcast %35 : vector<1x128xf32> to vector<128x128xf32>
    %37 = arith.addf %34, %36 : vector<128x128xf32>
    %c0_27 = arith.constant 0 : index
    %c0_28 = arith.constant 0 : index
    %38 = vector.load %arg12[%c0_27, %c0_28] : memref<128x128xf32, #tpu.memory_space<vmem>>, vector<128x128xf32>
    tpu.vector_store %arg12[%c0_27, %c0_28], %37 {strides = array<i32>} : memref<128x128xf32, #tpu.memory_space<vmem>>, vector<128x128xf32>,
    return
  }
  func.func @transform_0(%arg0: i32) -> (i32, i32) {
    %c0_i32 = arith.constant 0 : i32
    %c0_i32_0 = arith.constant 0 : i32
    return %arg0, %c0_i32 : i32, i32
  }
  func.func @transform_1(%arg0: i32) -> (i32, i32) {
    %c0_i32 = arith.constant 0 : i32
    %c0_i32_0 = arith.constant 0 : i32
    %c0_i32_1 = arith.constant 0 : i32
    return %c0_i32, %c0_i32_0 : i32, i32
  }
  func.func @transform_2(%arg0: i32) -> (i32, i32) {
    %c0_i32 = arith.constant 0 : i32
    %c0_i32_0 = arith.constant 0 : i32
    %c0_i32_1 = arith.constant 0 : i32
    return %c0_i32, %c0_i32_0 : i32, i32
  }
  func.func @transform_3(%arg0: i32) -> (i32, i32) {
    %c0_i32 = arith.constant 0 : i32
    %c0_i32_0 = arith.constant 0 : i32
    %c0_i32_1 = arith.constant 0 : i32
    return %c0_i32, %c0_i32_0 : i32, i32
  }
  func.func @transform_4(%arg0: i32) -> (i32, i32) {
    %c0_i32 = arith.constant 0 : i32
    %c0_i32_0 = arith.constant 0 : i32
    %c0_i32_1 = arith.constant 0 : i32
    return %c0_i32, %c0_i32_0 : i32, i32
  }
  func.func @transform_5(%arg0: i32) -> (i32, i32) {
    %c0_i32 = arith.constant 0 : i32
    %c0_i32_0 = arith.constant 0 : i32
    %c0_i32_1 = arith.constant 0 : i32
    return %c0_i32, %c0_i32_0 : i32, i32
  }
  func.func @transform_6(%arg0: i32) -> (i32, i32) {
    %c0_i32 = arith.constant 0 : i32
    %c0_i32_0 = arith.constant 0 : i32
    %c0_i32_1 = arith.constant 0 : i32
    return %c0_i32, %c0_i32_0 : i32, i32
  }
  func.func @transform_7(%arg0: i32) -> (i32, i32) {
    %c0_i32 = arith.constant 0 : i32
    %c0_i32_0 = arith.constant 0 : i32
    %c0_i32_1 = arith.constant 0 : i32
    return %c0_i32, %c0_i32_0 : i32, i32
  }
  func.func @transform_8(%arg0: i32) -> (i32, i32) {
    %c0_i32 = arith.constant 0 : i32
    %c0_i32_0 = arith.constant 0 : i32
    %c0_i32_1 = arith.constant 0 : i32
    return %c0_i32, %c0_i32_0 : i32, i32
  }
  func.func @transform_9(%arg0: i32) -> (i32, i32) {
    %c0_i32 = arith.constant 0 : i32
    %c0_i32_0 = arith.constant 0 : i32
    %c0_i32_1 = arith.constant 0 : i32
    return %c0_i32, %c0_i32_0 : i32, i32
  }
  func.func @transform_10(%arg0: i32) -> (i32, i32) {
    %c0_i32 = arith.constant 0 : i32
    %c0_i32_0 = arith.constant 0 : i32
    %c0_i32_1 = arith.constant 0 : i32
    return %c0_i32, %c0_i32_0 : i32, i32
  }
  func.func @transform_11(%arg0: i32) -> (i32, i32) {
    %c0_i32 = arith.constant 0 : i32
    %c0_i32_0 = arith.constant 0 : i32
    return %arg0, %c0_i32 : i32, i32
  }
}

</mosaic_0001>

<bundles_post_ra>
// kernel: tpu_custom_call.1
= control target key start
LH: loop header
LB: loop body
LE: loop exit
PB: predicated region body
PF: predicated region fallthrough
CT: control target
= control target key end

     0   :  { %s2869_s0 = inlined_call_operand.hbm [shape: bf16[256,128], index: 0, kind: input, shape index: {}]   ;;  %s2870_s1 = inlined_call_operand.hbm [shape: bf16[128,128], index: 1, kind: input, shape index: {}]   ;;  %s2871_s2 = inlined_call_operand.vmem [shape: f32[1,128], index: 2, kind: input, shape index: {}]   ;;  %s2872_s3 = inlined_call_operand.hbm [shape: bf16[128,128], index: 3, kind: input, shape index: {}]   ;;  %s2873_s4 = inlined_call_operand.vmem [shape: f32[1,128], index: 4, kind: input, shape index: {}]   ;;  %s2874_s5 = inlined_call_operand.hbm [shape: bf16[128,128], index: 5, kind: input, shape index: {}]   ;;  %s2875_s6 = inlined_call_operand.vmem [shape: f32[1,128], index: 6, kind: input, shape index: {}]   ;;  %s2876_s7 = inlined_call_operand.hbm [shape: bf16[128,128], index: 7, kind: input, shape index: {}]   ;;  %s2877_s8 = inlined_call_operand.vmem [shape: f32[1,128], index: 8, kind: input, shape index: {}]   ;;  %s2878_s9 = inlined_call_operand.hbm [shape: bf16[128,128], index: 9, kind: input, shape index: {}]   ;;  %s2879_s10 = inlined_call_operand.vmem [shape: f32[1,128], index: 10, kind: input, shape index: {}]   ;;  %s2880_s11 = inlined_call_operand.hbm [shape: f32[256,128], index: 11, kind: output, shape index: {}]  }
   0x1   :  { %2887 = sst [smem:[#allocation19_spill]] %s2870_s1 }
   0x2   :  { %2888 = sst [smem:[#allocation20_spill]] %s2872_s3 }
   0x3   :  { %2889 = sst [smem:[#allocation21_spill]] %s2874_s5 }
   0x4   :  { %2890 = sst [smem:[#allocation22_spill]] %s2876_s7 }
   0x5   :  { %2891 = sst [smem:[#allocation23_spill]] %s2878_s9 }
   0x6   :  { %16 = vsyncpa [#allocation3], 0 }
   0x7   :  { %18 = vsyncpa [#allocation3 + $0x1], 0 }
   0x8   :  { %19 = vsyncpa [#allocation6], 0 }
   0x9   :  { %20 = vsyncpa [#allocation9], 0 }
   0xa   :  { %21 = vsyncpa [#allocation12], 0 }
   0xb   :  { %22 = vsyncpa [#allocation4], 0 }
   0xc   :  { %24 = vsyncpa [#allocation4 + $0x1], 0  ;;  %s2447_s17 = smov 0   ;;  %s2449_s18 = smov 0  }
   0xd   :  { %s2451_s19 = smov 0   ;;  %s2453_s20 = smov 0  }
   0xe LB: > { %s2376_s21 = smov [#allocation5]   ;;  %s2468_s23 = sadd.s32 4294967295, %s2374_s20   ;;  %s2374_s20 = sphi %s2453_s20, %s2920_s20   ;;  %s2370_s19 = sphi %s2451_s19, %s2919_s19   ;;  %s2366_s18 = sphi %s2449_s18, %s2918_s18   ;;  %s2362_s17 = sphi %s2447_s17, %s2917_s17  }
   0xf   : > { %s309_s22 = sshll.u32 %s2376_s21, 4  ;;  %p1649_p0 = scmp.ge.s32.totalorder %s2374_s20, 1  ;;  %s310_s22 = int_to_ptr.vmem [resolvable:$true] %s309_s22 }
  0x10   : > { %p2883_p1 = scmp.eq.s32.totalorder %s2468_s23, 0  ;;  %p297_p2 = scmp.lt.s32.totalorder %s2374_s20, 3 }
  0x11   : > { %s2377_s25 = smov [#allocation8]   ;;  %s2378_s28 = smov [#allocation7]  }
  0x12   : > { %p2473_p3 = pnand %p1649_p0, %p297_p2  ;;  %s341_s26 = sshll.u32 %s2377_s25, 4  ;;  %s2486_s26 = int_to_ptr.vmem [resolvable:$true] %s341_s26 }
  0x13   : > { %s325_s29 = sshll.u32 %s2378_s28, 4  ;;  %s2151_s12 = scalar_lea.vmem %s310_s22, 1024  ;;  %s2488_s29 = int_to_ptr.vmem [resolvable:$true] %s325_s29 }
  0x14   : > { %s2892_s24 = scalar_select %p2473_p3, 1, 0 }
  0x15   : > { %p2007_p5 = pneg %p2473_p3  ;;  %p2152_p8 = scmp.ne.s32.totalorder %s310_s22, %s2151_s12 }
  0x16   : > { %p2159_p11 = scmp.lt.s32.totalorder %s310_s22, %s310_s22  ;;  %p2160_p12 = scmp.lt.s32.totalorder %s2151_s12, %s2151_s12 }
  0x17   : > { %p2482_p6 = pnand %p2007_p5, %p2883_p1 }
  0x18   : > { %p2161_p13 = por %p2160_p12, %p2159_p11 }
  0x19   : > { %p2492_p7 = pneg %p2482_p6 }
  0x1b   : > { %p2154_p9 = pnand %p2152_p8, %p2492_p7 }
  0x1d   : > { %p2155_p10 = pneg %p2154_p9 }
  0x1f   : > { %p2162_p0 = pnand %p2161_p13, %p2155_p10 }
  0x21   : > { %2165 = shalt.err (!%p2162_p0)
}
  0x22   : > { %s2881_s13 = smov 64   ;;  %s2882_s14 = smov 4  }
  0x23   : > { %s2895_s1 = sld [smem:[#allocation19_spill]]  ;;  %s2177_s21 = scalar_lea.vmem %s2486_s26, 1024 }
  0x24   : > { %p2178_p2 = scmp.ne.s32.totalorder %s2486_s26, %s2177_s21  ;;  %p2185_p9 = scmp.lt.s32.totalorder %s2486_s26, %s2486_s26 }
  0x25   : > { %p2186_p10 = scmp.lt.s32.totalorder %s2177_s21, %s2177_s21 }
  0x26   : > { %p2180_p5 = pnand %p2178_p2, %p2492_p7 }
  0x27   : > { %p2187_p11 = por %p2186_p10, %p2185_p9 }
  0x28   : > { %p2181_p8 = pneg %p2180_p5 }
  0x29   : > { %2010 = dma.hbm_to_vmem [thread:$0]  (!%p2482_p6), %s2895_s1, 1024, %s310_s22, [#allocation6], %s2881_s13, %s2881_s13, %s2882_s14  }
  0x2a   : > { %p2188_p12 = pnand %p2187_p11, %p2181_p8 }
  0x2c   : > { %2191 = shalt.err (!%p2188_p12)
}
  0x2d   : > { %s2896_s5 = sld [smem:[#allocation21_spill]]  ;;  %s2203_s22 = scalar_lea.vmem %s2488_s29, 1024 }
  0x2e   : > { %p2204_p13 = scmp.ne.s32.totalorder %s2488_s29, %s2203_s22  ;;  %p2211_p5 = scmp.lt.s32.totalorder %s2488_s29, %s2488_s29 }
  0x2f   : > { %p2212_p8 = scmp.lt.s32.totalorder %s2203_s22, %s2203_s22 }
  0x30   : > { %p2206_p0 = pnand %p2204_p13, %p2492_p7 }
  0x31   : > { %p2213_p9 = por %p2212_p8, %p2211_p5 }
  0x32   : > { %p2207_p2 = pneg %p2206_p0 }
  0x33   : > { %2016 = dma.hbm_to_vmem [thread:$0]  (!%p2482_p6), %s2896_s5, 1024, %s2486_s26, [#allocation9], %s2881_s13, %s2881_s13, %s2882_s14  }
  0x34   : > { %p2214_p10 = pnand %p2213_p9, %p2207_p2 }
  0x36   : > { %2217 = shalt.err (!%p2214_p10)
}
  0x37   : > { %s2897_s3 = sld [smem:[#allocation20_spill]]  ;;  %s2381_s26 = smov [#allocation10]  }
  0x38   : > { %s357_s16 = sshll.u32 %s2381_s26, 4  ;;  %s2382_s21 = smov [#allocation11]   ;;  %s358_s16 = int_to_ptr.vmem [resolvable:$true] %s357_s16 }
  0x39   : > { %s373_s25 = sshll.u32 %s2382_s21, 4  ;;  %s2229_s28 = scalar_lea.vmem %s358_s16, 1024  ;;  %s374_s25 = int_to_ptr.vmem [resolvable:$true] %s373_s25 }
  0x3a   : > { %p2230_p11 = scmp.ne.s32.totalorder %s358_s16, %s2229_s28  ;;  %p2237_p0 = scmp.lt.s32.totalorder %s358_s16, %s358_s16 }
  0x3b   : > { %p2238_p2 = scmp.lt.s32.totalorder %s2229_s28, %s2229_s28 }
  0x3c   : > { %p2232_p12 = pnand %p2230_p11, %p2492_p7 }
  0x3d   : > { %2013 = dma.hbm_to_vmem [thread:$0]  (!%p2482_p6), %s2897_s3, 1024, %s2488_s29, [#allocation6], %s2881_s13, %s2881_s13, %s2882_s14  }
  0x3e   : > { %p2233_p13 = pneg %p2232_p12  ;;  %p2239_p5 = por %p2238_p2, %p2237_p0 }
  0x40   : > { %p2240_p8 = pnand %p2239_p5, %p2233_p13 }
  0x42   : > { %2243 = shalt.err (!%p2240_p8)
}
  0x43   : > { %s2898_s7 = sld [smem:[#allocation22_spill]]  ;;  %s2255_s12 = scalar_lea.vmem %s374_s25, 1024 }
  0x44   : > { %p2256_p9 = scmp.ne.s32.totalorder %s374_s25, %s2255_s12  ;;  %p2263_p12 = scmp.lt.s32.totalorder %s374_s25, %s374_s25 }
  0x45   : > { %p2264_p0 = scmp.lt.s32.totalorder %s2255_s12, %s2255_s12 }
  0x46   : > { %p2258_p10 = pnand %p2256_p9, %p2492_p7 }
  0x47   : > { %p2265_p13 = por %p2264_p0, %p2263_p12 }
  0x48   : > { %p2259_p11 = pneg %p2258_p10 }
  0x49   : > { %2019 = dma.hbm_to_vmem [thread:$0]  (!%p2482_p6), %s2898_s7, 1024, %s358_s16, [#allocation9], %s2881_s13, %s2881_s13, %s2882_s14  }
  0x4a   : > { %p2266_p2 = pnand %p2265_p13, %p2259_p11 }
  0x4c   : > { %2269 = shalt.err (!%p2266_p2)
}
  0x4d   : > { %s2899_s9 = sld [smem:[#allocation23_spill]]  ;;  %s1648_s27 = sadd.s32 4294967294, %s2374_s20  }
  0x4e   : > { %s2558_s30 = sadd.s32 1, %s2374_s20   ;;  %s37_s16 = sadd.s32 1, %s2370_s19 }
  0x4f   : > { %s34_s21 = ssub.s32 %s2374_s20, %s2558_s30  ;;  %p44_p7 = scmp.ne.s32.totalorder %s2370_s19, %s2366_s18 }
  0x50   : > { %p35_p5 = scmp.eq.s32.totalorder %s34_s21, 0  ;;  %p45_p8 = scmp.eq.s32.totalorder %s2374_s20, 0 }
  0x51   : > { %p50_p9 = scmp.ne.s32.totalorder %s2366_s18, %s2362_s17  ;;  %p284_p10 = scmp.eq.s32.totalorder %s2468_s23, 1 }
  0x52   : > { %s2570_s28 = scalar_select %p35_p5, %s2370_s19, %s37_s16  }
  0x53   : > { %2022 = dma.hbm_to_vmem [thread:$0]  (!%p2482_p6), %s2899_s9, 1024, %s374_s25, [#allocation12], %s2881_s13, %s2881_s13, %s2882_s14  }
  0x54   : > { %p46_p11 = por %p45_p8, %p44_p7  ;;  %p2574_p12 = por %p2883_p1, %p50_p9 }
  0x55   : > { %p2578_p6 = por %p284_p10, %p44_p7  ;;  %p290_p0 = scmp.eq.s32.totalorder %s1648_s27, 1 }
  0x56   : > { %s2900_s29 = scalar_select %p2574_p12, 1, 0 }
  0x57   : > { %s2901_s25 = scalar_select %p2578_p6, 1, 0 }
  0x58   : > { %p2036_p13 = scmp.lt.s32.totalorder %s2374_s20, 2  ;;  %s390_s22 = sand.u32 1, %s2370_s19  }
  0x59   : > { %p2584_p2 = por %p290_p0, %p50_p9  ;;  %s1656_s15 = sshll.u32 %s390_s22, 6 }
  0x5a   : > { %s1725_s26 = sshll.u32 %s2374_s20, 10  ;;  %s394_s14 = scalar_lea.vmem [#allocation2], %s1656_s15 }
  0x5b   : > { %s2902_s12 = scalar_select %p2584_p2, 1, 0 }
  0x5c   : > { %s2592_s13 = scalar_lea.hbm %s2869_s0, %s1725_s26  ;;  %s401_s1 = sshll.u32 %s394_s14, 4  ;;  %s2598_s1 = int_to_ptr.vmem [resolvable:$true] %s401_s1 }
  0x5d   : > { %p2594_p7 = pnand %p2036_p13, %p46_p11  ;;  %s2600_s3 = scalar_lea.sflag [#allocation3], %s390_s22 }
  0x5e   : > { %s2270_s5 = scalar_lea.hbm %s2592_s13, 1024  ;;  %s2275_s15 = scalar_lea.hbm %s2869_s0, 2048 }
  0x5f   : > { %p2271_p5 = scmp.ne.s32.totalorder %s2592_s13, %s2270_s5  ;;  %p2272_p8 = pneg %p2594_p7 }
  0x60   : > { %p2276_p11 = scmp.lt.s32.totalorder %s2592_s13, %s2869_s0  ;;  %p2277_p0 = scmp.lt.s32.totalorder %s2275_s15, %s2270_s5 }
  0x61   : > { %p2273_p9 = pnand %p2272_p8, %p2271_p5 }
  0x62   : > { %p2278_p13 = por %p2277_p0, %p2276_p11 }
  0x63   : > { %p2274_p10 = pneg %p2273_p9 }
  0x65   : > { %p2279_p4 = pnand %p2278_p13, %p2274_p10 }
  0x67   : > { %2282 = shalt.err (!%p2279_p4)
}
  0x68   : > { %s2283_s22 = scalar_lea.vmem %s2598_s1, 1024  ;;  %s2383_s7 = smov [#allocation2]  }
  0x69   : > { %p2284_p1 = scmp.ne.s32.totalorder %s2598_s1, %s2283_s22  ;;  %s2288_s9 = sshll.u32 %s2383_s7, 4  ;;  %s2289_s9 = int_to_ptr.vmem [resolvable:$false] %s2288_s9 }
  0x6a   : > { %s2290_s26 = scalar_lea.vmem %s2289_s9, 2048  ;;  %p2291_p9 = scmp.lt.s32.totalorder %s2598_s1, %s2289_s9 }
  0x6b   : > { %p2286_p2 = pnand %p2284_p1, %p2272_p8  ;;  %p2292_p6 = scmp.lt.s32.totalorder %s2290_s26, %s2283_s22 }
  0x6d   : > { %p2287_p5 = pneg %p2286_p2  ;;  %p2293_p12 = por %p2292_p6, %p2291_p9 }
  0x6f   : > { %p2294_p3 = pnand %p2293_p12, %p2287_p5 }
  0x71   : > { %2297 = shalt.err (!%p2294_p3)
}
  0x72   : > { %s2904_s5 = smov 4   ;;  %s2905_s16 = smov 64  }
  0x73   : > { %2026 = dma.hbm_to_vmem [thread:$0]  (!%p2594_p7), %s2592_s13, 1024, %s2598_s1, %s2600_s3, %s2905_s16, %s2905_s16, %s2904_s5  }
  0x74   : > { %p2906_p1 = scmp.ne.s32.totalorder %s2892_s24, 0 }
  0x75   : > { %s2627_s7 = sand.u32 (!%p2906_p1), 1, %s2366_s18   ;;  %p2907_p3 = scmp.ne.s32.totalorder (!%p2906_p1), %s2900_s29, 0 }
  0x76   : > { %413 = sbr.rel (%p2906_p1) target bundleno = 1230 (0x4ce), region = 64  ;;  %s1660_s9 = sshll.u32 (!%p2906_p1), %s2627_s7, 6 }
  0x77   : > { %s416_s15 = scalar_lea.sflag (!%p2906_p1), [#allocation3], %s2627_s7  ;;  %s2631_s14 = scalar_lea.vmem (!%p2906_p1), [#allocation2], %s1660_s9 }
  0x7b   : > { %2341 = dma.done.wait (%p2907_p3), %s416_s15, 1024  }
  0x7c   : > { %2343 = vsyncadd (%p2907_p3), %s416_s15, 4294966272  ;;  %p2908_p4 = scmp.eq.s32.totalorder %s2468_s23, 0 }
  0x7e   : > { %2345 = dma.done.wait (%p2908_p4), [#allocation6], 2048   ;;  %p2909_p12 = pmov %p2908_p4 }
  0x7f   : > { %p2910_p6 = pmov %p2908_p4 }
  0x80   : > { %2347 = vsyncadd (%p2909_p12), [#allocation6], 4294965248 }
  0x81   : > { %2349 = dma.done.wait (%p2910_p6), [#allocation9], 2048   ;;  %p2911_p2 = pmov %p2908_p4 }
  0x83   : > { %2351 = vsyncadd (%p2911_p2), [#allocation9], 4294965248  ;;  %p2912_p7 = pmov %p2911_p2 }
  0x84   : > { %p2913_p8 = pmov %p2911_p2 }
  0x85   : > { %2353 = dma.done.wait (%p2912_p7), [#allocation12], 1024  }
  0x86   : > { %2355 = vsyncadd (%p2913_p8), [#allocation12], 4294966272  ;;  %v2084_v0 = vld [vmem:[#allocation5 + $0x38] sm:$0xff]   ;;  %v2085_v1 = vld [vmem:[#allocation5 + $0x30] sm:$0xff]   ;;  %s1666_s26 = sshll.u32 %s2627_s7, 7  ;;  %s1726_s15 = sshll.u32 %s2468_s23, 11 }
  0x87   : > { %1807 = vmatprep.subr.bf16.mxu0 %v2084_v0  ;;  %v2086_v2 = vld [vmem:[#allocation5 + $0x28] sm:$0xff]   ;;  %v2087_v3 = vld [vmem:[#allocation5 + $0x20] sm:$0xff]   ;;  %v2088_v5 = vld [vmem:[#allocation5 + $0x18] sm:$0xff]   ;;  %s2801_s9 = scalar_lea.vmem [#allocation13], %s1666_s26  ;;  %s2822_s24 = scalar_lea.hbm %s2880_s11, %s1726_s15 }
  0x88   : > { %1808 = vmatpush3.bf16.msra.mxu0 %v2084_v0  ;;  %v2650_v4 = vld [vmem:[%s2631_s14] sm:$0xff]   ;;  %v2100_v6 = vld [vmem:[#allocation7 + $0x38] sm:$0xff]   ;;  %v2101_v7 = vld [vmem:[#allocation7 + $0x30] sm:$0xff]   ;;  %s1514_s13 = scalar_lea.sflag [#allocation4], %s2627_s7  ;;  %p2914_p11 = scmp.ne.s32.totalorder %s2901_s25, 0 }
  0x89   : > { %1809 = vmatprep.subr.bf16.mxu0 %v2085_v1  ;;  %1823 = vmatprep.mubr.bf16.mxu0 %v2650_v4  ;;  %v2089_v8 = vld [vmem:[#allocation5 + $0x10] sm:$0xff]   ;;  %v2102_v9 = vld [vmem:[#allocation7 + $0x28] sm:$0xff]   ;;  %v2103_v10 = vld [vmem:[#allocation7 + $0x20] sm:$0xff]   ;;  %v497_v34 = vunpack.c.l.bf16 %v2650_v4  ;;  %v498_v35 = vunpack.c.h.bf16 %v2650_v4  ;;  %s2384_s29 = smov [#allocation13]  }
  0x8a   : > { %1839 = vmatprep.subr.bf16.mxu1 %v2100_v6  ;;  %v2090_v11 = vld [vmem:[#allocation5 + $0x8] sm:$0xff]   ;;  %v2104_v12 = vld [vmem:[#allocation7 + $0x18] sm:$0xff]   ;;  %v2091_v13 = vld [vmem:[#allocation5] sm:$0xff]   ;;  %s2302_s27 = sshll.u32 %s2384_s29, 4  ;;  %s2303_s27 = int_to_ptr.vmem [resolvable:$false] %s2302_s27 }
  0x8b   : > { %1840 = vmatpush3.bf16.msra.mxu1 %v2100_v6  ;;  %v2654_v14 = vld [vmem:[%s2631_s14 + $0x8] sm:$0xff]   ;;  %v2657_v15 = vld [vmem:[%s2631_s14 + $0x10] sm:$0xff]   ;;  %v2662_v16 = vld [vmem:[%s2631_s14 + $0x18] sm:$0xff]   ;;  %s2304_s21 = scalar_lea.vmem %s2303_s27, 4096 }
  0x8c   : > { %1810 = vmatpush3.bf16.msra.mxu0 %v2085_v1  ;;  %1841 = vmatprep.subr.bf16.mxu1 %v2101_v7  ;;  %v2665_v17 = vld [vmem:[%s2631_s14 + $0x20] sm:$0xff]   ;;  %v2670_v18 = vld [vmem:[%s2631_s14 + $0x28] sm:$0xff]   ;;  %v2673_v19 = vld [vmem:[%s2631_s14 + $0x30] sm:$0xff]   ;;  %v500_v32 = vunpack.c.h.bf16 %v2654_v14  ;;  %v499_v38 = vunpack.c.l.bf16 %v2654_v14  ;;  %v504_v49 = vunpack.c.h.bf16 %v2662_v16  ;;  %v501_v52 = vunpack.c.l.bf16 %v2657_v15 }
  0x8d   : > { %1811 = vmatprep.subr.bf16.mxu0 %v2086_v2  ;;  %v2678_v20 = vld [vmem:[%s2631_s14 + $0x38] sm:$0xff]   ;;  %v2105_v21 = vld [vmem:[#allocation7 + $0x10] sm:$0xff]   ;;  %v2106_v22 = vld [vmem:[#allocation7 + $0x8] sm:$0xff]   ;;  %v502_v55 = vunpack.c.h.bf16 %v2657_v15  ;;  %v503_v56 = vunpack.c.l.bf16 %v2662_v16  ;;  %s1527_s14 = sshll.u32 %s2801_s9, 4  ;;  %s2824_s14 = int_to_ptr.vmem [resolvable:$true] %s1527_s14 }
  0x8e   : > { %v2107_v23 = vld [vmem:[#allocation7] sm:$0xff]   ;;  %v2108_v24 = vld [vmem:[#allocation8 + $0x38] sm:$0xff]   ;;  %v2109_v25 = vld [vmem:[#allocation8 + $0x30] sm:$0xff]   ;;  %s2298_s23 = scalar_lea.vmem %s2824_s14, 2048  ;;  %p2305_p5 = scmp.lt.s32.totalorder %s2824_s14, %s2303_s27 }
  0x8f   : > { %1842 = vmatpush3.bf16.msra.mxu1 %v2101_v7  ;;  %v2110_v26 = vld [vmem:[#allocation8 + $0x28] sm:$0xff]   ;;  %v2111_v27 = vld [vmem:[#allocation8 + $0x20] sm:$0xff]   ;;  %v2112_v28 = vld [vmem:[#allocation8 + $0x18] sm:$0xff]   ;;  %v505_v7 = vunpack.c.l.bf16 %v2665_v17  ;;  %p2299_p10 = scmp.ne.s32.totalorder %s2824_s14, %s2298_s23  ;;  %p2306_p9 = scmp.lt.s32.totalorder %s2304_s21, %s2298_s23 }
  0x90   : > { %1812 = vmatpush3.bf16.msra.mxu0 %v2086_v2  ;;  %1843 = vmatprep.subr.bf16.mxu1 %v2102_v9  ;;  %v2684_v31 = vld [vmem:[%s2871_s2] ss:$0 sm:$0xff] }
  0x91   : > { %1813 = vmatprep.subr.bf16.mxu0 %v2087_v3  ;;  %p2300_p0 = pnand %p2299_p10, %p2914_p11  ;;  %p2307_p1 = por %p2306_p9, %p2305_p5 }
  0x93   : > { %1844 = vmatpush3.bf16.msra.mxu1 %v2102_v9  ;;  %p2301_p13 = pneg %p2300_p0 }
  0x94   : > { %1814 = vmatpush3.bf16.msra.mxu0 %v2087_v3  ;;  %1845 = vmatprep.subr.bf16.mxu1 %v2103_v10  ;;  %v508_v3 = vunpack.c.h.bf16 %v2670_v18 }
  0x95   : > { %1815 = vmatprep.subr.bf16.mxu0 %v2088_v5  ;;  %p2308_p3 = pnand %p2307_p1, %p2301_p13 }
  0x97   : > { %1846 = vmatpush3.bf16.msra.mxu1 %v2103_v10  ;;  %v506_v10 = vunpack.c.h.bf16 %v2665_v17 }
  0x98   : > { %1816 = vmatpush3.bf16.msra.mxu0 %v2088_v5  ;;  %1847 = vmatprep.subr.bf16.mxu1 %v2104_v12 }
  0x99   : > { %1817 = vmatprep.subr.bf16.mxu0 %v2089_v8 }
  0x9b   : > { %1848 = vmatpush3.bf16.msra.mxu1 %v2104_v12 }
  0x9c   : > { %1818 = vmatpush3.bf16.msra.mxu0 %v2089_v8  ;;  %1849 = vmatprep.subr.bf16.mxu1 %v2105_v21 }
  0x9d   : > { %1819 = vmatprep.subr.bf16.mxu0 %v2090_v11 }
  0x9f   : > { %1850 = vmatpush3.bf16.msra.mxu1 %v2105_v21 }
  0xa0   : > { %1820 = vmatpush3.bf16.msra.mxu0 %v2090_v11  ;;  %1851 = vmatprep.subr.bf16.mxu1 %v2106_v22  ;;  %v507_v11 = vunpack.c.l.bf16 %v2670_v18 }
  0xa1   : > { %1821 = vmatprep.subr.bf16.mxu0 %v2091_v13 }
  0xa3   : > { %1852 = vmatpush3.bf16.msra.mxu1 %v2106_v22 }
  0xa4   : > { %1822 = vmatpush3.bf16.msra.mxu0 %v2091_v13  ;;  %1853 = vmatprep.subr.bf16.mxu1 %v2107_v23 }
  0xa5   : > { %1871 = vmatprep.subr.bf16.mxu0 %v2108_v24 }
  0xa7   : > { %1824 = vmatmul.mubr.bf16.vlgmr.msra.gmra.mxu0 %v2654_v14  ;;  %1854 = vmatpush3.bf16.msra.mxu1 %v2107_v23 }
  0xa8   : > { %1827 = vmatprep.mubr.bf16.mxu0 %v2657_v15  ;;  %1872 = vmatpush3.bf16.msra.mxu0 %v2108_v24 }
  0xa9   : > { %1873 = vmatprep.subr.bf16.mxu0 %v2109_v25 }
  0xac   : > { %1874 = vmatpush3.bf16.msra.mxu0 %v2109_v25 }
  0xad   : > { %1875 = vmatprep.subr.bf16.mxu0 %v2110_v26 }
  0xaf   : > { %1828 = vmatmul.mubr.bf16.gmra.mxu0 %v2662_v16 }
  0xb0   : > { %1831 = vmatprep.mubr.bf16.mxu0 %v2665_v17  ;;  %1876 = vmatpush3.bf16.msra.mxu0 %v2110_v26 }
  0xb1   : > { %1877 = vmatprep.subr.bf16.mxu0 %v2111_v27 }
  0xb4   : > { %1878 = vmatpush3.bf16.msra.mxu0 %v2111_v27 }
  0xb5   : > { %1879 = vmatprep.subr.bf16.mxu0 %v2112_v28 }
  0xb7   : > { %1832 = vmatmul.mubr.bf16.gmra.mxu0 %v2670_v18 }
  0xb8   : > { %1835 = vmatprep.mubr.bf16.mxu0 %v2673_v19  ;;  %1880 = vmatpush3.bf16.msra.mxu0 %v2112_v28 }
  0xbf   : > { %1836 = vmatmul.mubr.bf16.gmra.mxu0 %v2678_v20 }
 0x167   : > { %v1825_v29 = vpop.f32.mrf.mxu0 }
 0x168   : > { %v675_v39 = vadd.f32 %v1825_v29, %v2684_v31  ;;  %v512_v29 = vunpack.c.h.bf16 %v2678_v20 }
 0x169   : > { %v666_v30 = vpop.f32.mrf.mxu0 }
 0x16a   : > { %v667_v36 = vadd.f32 %v2684_v31, %v666_v30  ;;  %v731_v46 = vmul.f32 %v675_v39, %v499_v38 }
 0x16b   : > { %v1826_v33 = vpop.f32.mrf.mxu0 }
 0x16c   : > { %v678_v37 = vadd.f32 %v1826_v33, %v2684_v31  ;;  %v729_v44 = vmul.f32 %v667_v36, %v497_v34  ;;  %v509_v36 = vunpack.c.l.bf16 %v2673_v19 }
 0x16d   : > { %v669_v40 = vpop.f32.mrf.mxu0 }
 0x16e   : > { %v670_v41 = vadd.f32 %v2684_v31, %v669_v40  ;;  %v732_v42 = vmul.f32 %v678_v37, %v500_v32  ;;  %v510_v40 = vunpack.c.h.bf16 %v2673_v19  ;;  %v2126_v19 = vld [vmem:[#allocation11 + $0x28] sm:$0xff]  }
 0x16f   : > { %v1829_v43 = vpop.f32.mrf.mxu0 }
 0x170   : > { %v730_v45 = vmul.f32 %v670_v41, %v498_v35  ;;  %v746_v51 = vpack.c.bf16 %v732_v42, %v731_v46  ;;  %v691_v57 = vadd.f32 %v1829_v43, %v2684_v31  ;;  %v511_v41 = vunpack.c.l.bf16 %v2678_v20  ;;  %v2127_v20 = vld [vmem:[#allocation11 + $0x20] sm:$0xff]  }
 0x171   : > { %v682_v47 = vpop.f32.mrf.mxu0 }
 0x172   : > { %v745_v48 = vpack.c.bf16 %v730_v45, %v729_v44  ;;  %v683_v53 = vadd.f32 %v2684_v31, %v682_v47  ;;  %v735_v0 = vmul.f32 %v691_v57, %v503_v56  ;;  %v2116_v57 = vld [vmem:[#allocation10 + $0x38] sm:$0xff]  }
 0x173   : > { %v1830_v50 = vpop.f32.mrf.mxu0  ;;  %1903 = vmatprep.subr.bf16.mxu1 %v2116_v57 }
 0x174   : > { %v694_v54 = vadd.f32 %v1830_v50, %v2684_v31  ;;  %1855 = vmatprep.mubr.bf16.mxu1 %v745_v48  ;;  %v733_v62 = vmul.f32 %v683_v53, %v501_v52  ;;  %v2113_v53 = vld [vmem:[#allocation8 + $0x10] sm:$0xff]  }
 0x175   : > { %v685_v58 = vpop.f32.mrf.mxu0  ;;  %1856 = vmatmul.mubr.bf16.vlgmr.msra.gmra.mxu1 %v746_v51  ;;  %1881 = vmatprep.subr.bf16.mxu0 %v2113_v53 }
 0x176   : > { %v686_v59 = vadd.f32 %v2684_v31, %v685_v58  ;;  %v736_v60 = vmul.f32 %v694_v54, %v504_v49  ;;  %1882 = vmatpush3.bf16.msra.mxu0 %v2113_v53  ;;  %v2115_v54 = vld [vmem:[#allocation8] sm:$0xff]   ;;  %v2117_v58 = vld [vmem:[#allocation10 + $0x30] sm:$0xff]   ;;  %1904 = vmatpush3.bf16.msra.mxu1 %v2116_v57 }
 0x177   : > { %v1833_v61 = vpop.f32.mrf.mxu0  ;;  %1905 = vmatprep.subr.bf16.mxu1 %v2117_v58 }
 0x178   : > { %v734_v63 = vmul.f32 %v686_v59, %v502_v55  ;;  %v748_v6 = vpack.c.bf16 %v736_v60, %v735_v0  ;;  %v707_v12 = vadd.f32 %v1833_v61, %v2684_v31  ;;  %v2118_v59 = vld [vmem:[#allocation10 + $0x28] sm:$0xff]   ;;  %v2119_v60 = vld [vmem:[#allocation10 + $0x20] sm:$0xff]   ;;  %v2120_v61 = vld [vmem:[#allocation10 + $0x18] sm:$0xff]  }
 0x179   : > { %v698_v1 = vpop.f32.mrf.mxu0  ;;  %v1684_v0 = vld [vmem:[%s2873_s4] ss:$0 sm:$0xff] }
 0x17a   : > { %v747_v2 = vpack.c.bf16 %v734_v63, %v733_v62  ;;  %v699_v8 = vadd.f32 %v2684_v31, %v698_v1  ;;  %v739_v26 = vmul.f32 %v707_v12, %v507_v11  ;;  %1906 = vmatpush3.bf16.msra.mxu1 %v2117_v58 }
 0x17b   : > { %v1834_v5 = vpop.f32.mrf.mxu0  ;;  %1907 = vmatprep.subr.bf16.mxu1 %v2118_v59 }
 0x17c   : > { %v710_v9 = vadd.f32 %v1834_v5, %v2684_v31  ;;  %1859 = vmatprep.mubr.bf16.mxu1 %v747_v2  ;;  %v737_v24 = vmul.f32 %v699_v8, %v505_v7 }
 0x17d   : > { %v701_v13 = vpop.f32.mrf.mxu0  ;;  %1860 = vmatmul.mubr.bf16.gmra.mxu1 %v748_v6 }
 0x17e   : > { %v702_v21 = vadd.f32 %v2684_v31, %v701_v13  ;;  %v740_v22 = vmul.f32 %v710_v9, %v508_v3  ;;  %1908 = vmatpush3.bf16.msra.mxu1 %v2118_v59 }
 0x17f   : > { %v1837_v23 = vpop.f32.mrf.mxu0  ;;  %1909 = vmatprep.subr.bf16.mxu1 %v2119_v60 }
 0x180   : > { %v738_v25 = vmul.f32 %v702_v21, %v506_v10  ;;  %v750_v33 = vpack.c.bf16 %v740_v22, %v739_v26  ;;  %v723_v42 = vadd.f32 %v1837_v23, %v2684_v31 }
 0x181   : > { %v714_v27 = vpop.f32.mrf.mxu0 }
 0x182   : > { %v749_v28 = vpack.c.bf16 %v738_v25, %v737_v24  ;;  %v715_v37 = vadd.f32 %v2684_v31, %v714_v27  ;;  %v743_v48 = vmul.f32 %v723_v42, %v511_v41  ;;  %1910 = vmatpush3.bf16.msra.mxu1 %v2119_v60 }
 0x183   : > { %v1838_v30 = vpop.f32.mrf.mxu0  ;;  %1911 = vmatprep.subr.bf16.mxu1 %v2120_v61 }
 0x184   : > { %v726_v39 = vadd.f32 %v1838_v30, %v2684_v31  ;;  %1863 = vmatprep.mubr.bf16.mxu1 %v749_v28  ;;  %v741_v46 = vmul.f32 %v715_v37, %v509_v36 }
 0x185   : > { %v717_v43 = vpop.f32.mrf.mxu0  ;;  %1864 = vmatmul.mubr.bf16.gmra.mxu1 %v750_v33 }
 0x186   : > { %v718_v44 = vadd.f32 %v2684_v31, %v717_v43  ;;  %v744_v45 = vmul.f32 %v726_v39, %v512_v29  ;;  %v2114_v31 = vld [vmem:[#allocation8 + $0x8] sm:$0xff]   ;;  %1912 = vmatpush3.bf16.msra.mxu1 %v2120_v61  ;;  %v2121_v61 = vld [vmem:[#allocation10 + $0x10] sm:$0xff]  }
 0x187   : > { %1883 = vmatprep.subr.bf16.mxu0 %v2114_v31  ;;  %1913 = vmatprep.subr.bf16.mxu1 %v2121_v61 }
 0x188   : > { %v742_v47 = vmul.f32 %v718_v44, %v510_v40  ;;  %v752_v51 = vpack.c.bf16 %v744_v45, %v743_v48  ;;  %1884 = vmatpush3.bf16.msra.mxu0 %v2114_v31 }
 0x189   : > { %1885 = vmatprep.subr.bf16.mxu0 %v2115_v54 }
 0x18a   : > { %v751_v50 = vpack.c.bf16 %v742_v47, %v741_v46  ;;  %1914 = vmatpush3.bf16.msra.mxu1 %v2121_v61 }
 0x18c   : > { %1867 = vmatprep.mubr.bf16.mxu1 %v751_v50  ;;  %1886 = vmatpush3.bf16.msra.mxu0 %v2115_v54 }
 0x18d   : > { %1868 = vmatmul.mubr.bf16.gmra.mxu1 %v752_v51 }
 0x235   : > { %v1857_v62 = vpop.f32.mrf.mxu1 }
 0x236   : > { %v867_v6 = vadd.f32 %v1857_v62, %v1684_v0  ;;  %v2122_v62 = vld [vmem:[#allocation10 + $0x8] sm:$0xff]  }
 0x237   : > { %v858_v63 = vpop.f32.mrf.mxu1  ;;  %1915 = vmatprep.subr.bf16.mxu1 %v2122_v62 }
 0x238   : > { %v859_v2 = vadd.f32 %v1684_v0, %v858_v63  ;;  %v923_v23 = vmul.f32 %v867_v6, %v499_v38  ;;  %1916 = vmatpush3.bf16.msra.mxu1 %v2122_v62  ;;  %v2125_v63 = vld [vmem:[#allocation11 + $0x30] sm:$0xff]  }
 0x239   : > { %v1858_v1 = vpop.f32.mrf.mxu1  ;;  %v2129_v62 = vld [vmem:[#allocation11 + $0x10] sm:$0xff]  }
 0x23a   : > { %v870_v5 = vadd.f32 %v1858_v1, %v1684_v0  ;;  %v921_v21 = vmul.f32 %v859_v2, %v497_v34  ;;  %v1693_v1 = vld [vmem:[%s2875_s6] ss:$0 sm:$0xff] }
 0x23b   : > { %v861_v8 = vpop.f32.mrf.mxu1 }
 0x23c   : > { %v862_v9 = vadd.f32 %v1684_v0, %v861_v8  ;;  %v924_v12 = vmul.f32 %v870_v5, %v500_v32 }
 0x23d   : > { %v1861_v13 = vpop.f32.mrf.mxu1 }
 0x23e   : > { %v922_v22 = vmul.f32 %v862_v9, %v498_v35  ;;  %v938_v26 = vpack.c.bf16 %v924_v12, %v923_v23  ;;  %v883_v33 = vadd.f32 %v1861_v13, %v1684_v0 }
 0x23f   : > { %v874_v24 = vpop.f32.mrf.mxu1 }
 0x240   : > { %v937_v25 = vpack.c.bf16 %v922_v22, %v921_v21  ;;  %v875_v28 = vadd.f32 %v1684_v0, %v874_v24  ;;  %v927_v35 = vmul.f32 %v883_v33, %v503_v56 }
 0x241   : > { %v1862_v27 = vpop.f32.mrf.mxu1 }
 0x242   : > { %v886_v30 = vadd.f32 %v1862_v27, %v1684_v0  ;;  %1887 = vmatprep.mubr.bf16.mxu0 %v937_v25  ;;  %v925_v4 = vmul.f32 %v875_v28, %v501_v52 }
 0x243   : > { %v877_v37 = vpop.f32.mrf.mxu1  ;;  %1888 = vmatmul.mubr.bf16.vlgmr.msra.gmra.mxu0 %v938_v26 }
 0x244   : > { %v878_v32 = vadd.f32 %v1684_v0, %v877_v37  ;;  %v928_v34 = vmul.f32 %v886_v30, %v504_v49 }
 0x245   : > { %v1865_v39 = vpop.f32.mrf.mxu1 }
 0x246   : > { %v926_v14 = vmul.f32 %v878_v32, %v502_v55  ;;  %v940_v44 = vpack.c.bf16 %v928_v34, %v927_v35  ;;  %v899_v47 = vadd.f32 %v1865_v39, %v1684_v0 }
 0x247   : > { %v890_v38 = vpop.f32.mrf.mxu1 }
 0x248   : > { %v939_v42 = vpack.c.bf16 %v926_v14, %v925_v4  ;;  %v891_v45 = vadd.f32 %v1684_v0, %v890_v38  ;;  %v931_v55 = vmul.f32 %v899_v47, %v507_v11 }
 0x249   : > { %v1866_v43 = vpop.f32.mrf.mxu1 }
 0x24a   : > { %v902_v46 = vadd.f32 %v1866_v43, %v1684_v0  ;;  %1891 = vmatprep.mubr.bf16.mxu0 %v939_v42  ;;  %v929_v15 = vmul.f32 %v891_v45, %v505_v7 }
 0x24b   : > { %v893_v48 = vpop.f32.mrf.mxu1  ;;  %1892 = vmatmul.mubr.bf16.gmra.mxu0 %v940_v44 }
 0x24c   : > { %v894_v49 = vadd.f32 %v1684_v0, %v893_v48  ;;  %v932_v52 = vmul.f32 %v902_v46, %v508_v3 }
 0x24d   : > { %v1869_v50 = vpop.f32.mrf.mxu1 }
 0x24e   : > { %v930_v16 = vmul.f32 %v894_v49, %v506_v10  ;;  %v942_v31 = vpack.c.bf16 %v932_v52, %v931_v55  ;;  %v915_v58 = vadd.f32 %v1869_v50, %v1684_v0 }
 0x24f   : > { %v906_v56 = vpop.f32.mrf.mxu1 }
 0x250   : > { %v941_v51 = vpack.c.bf16 %v930_v16, %v929_v15  ;;  %v907_v54 = vadd.f32 %v1684_v0, %v906_v56  ;;  %v935_v10 = vmul.f32 %v915_v58, %v511_v41 }
 0x251   : > { %v1870_v53 = vpop.f32.mrf.mxu1 }
 0x252   : > { %v918_v57 = vadd.f32 %v1870_v53, %v1684_v0  ;;  %1895 = vmatprep.mubr.bf16.mxu0 %v941_v51  ;;  %v933_v17 = vmul.f32 %v907_v54, %v509_v36  ;;  %v2124_v36 = vld [vmem:[#allocation11 + $0x38] sm:$0xff]  }
 0x253   : > { %v909_v59 = vpop.f32.mrf.mxu1  ;;  %1896 = vmatmul.mubr.bf16.gmra.mxu0 %v942_v31  ;;  %1935 = vmatprep.subr.bf16.mxu0 %v2124_v36 }
 0x254   : > { %v910_v3 = vadd.f32 %v1684_v0, %v909_v59  ;;  %v936_v7 = vmul.f32 %v918_v57, %v512_v29  ;;  %v2123_v29 = vld [vmem:[#allocation10] sm:$0xff]   ;;  %1936 = vmatpush3.bf16.msra.mxu0 %v2124_v36 }
 0x255   : > { %1917 = vmatprep.subr.bf16.mxu1 %v2123_v29  ;;  %1937 = vmatprep.subr.bf16.mxu0 %v2125_v63 }
 0x256   : > { %v934_v18 = vmul.f32 %v910_v3, %v510_v40  ;;  %v944_v60 = vpack.c.bf16 %v936_v7, %v935_v10  ;;  %1918 = vmatpush3.bf16.msra.mxu1 %v2123_v29  ;;  %v2785_v40 = vld [vmem:[#allocation11 + $0x18] sm:$0xff]   ;;  %v2130_v29 = vld [vmem:[#allocation11 + $0x8] sm:$0xff]  }
 0x257   : > { %1967 = vmatprep.subr.bf16.mxu1 %v2124_v36 }
 0x258   : > { %v943_v11 = vpack.c.bf16 %v934_v18, %v933_v17  ;;  %1938 = vmatpush3.bf16.msra.mxu0 %v2125_v63 }
 0x259   : > { %1939 = vmatprep.subr.bf16.mxu0 %v2126_v19 }
 0x25a   : > { %1899 = vmatprep.mubr.bf16.mxu0 %v943_v11 }
 0x25b   : > { %1900 = vmatmul.mubr.bf16.gmra.mxu0 %v944_v60 }
 0x25c   : > { %1940 = vmatpush3.bf16.msra.mxu0 %v2126_v19 }
 0x25d   : > { %1941 = vmatprep.subr.bf16.mxu0 %v2127_v20 }
 0x260   : > { %1942 = vmatpush3.bf16.msra.mxu0 %v2127_v20 }
 0x261   : > { %1943 = vmatprep.subr.bf16.mxu0 %v2785_v40 }
 0x264   : > { %1944 = vmatpush3.bf16.msra.mxu0 %v2785_v40 }
 0x265   : > { %1945 = vmatprep.subr.bf16.mxu0 %v2129_v62 }
 0x268   : > { %1946 = vmatpush3.bf16.msra.mxu0 %v2129_v62 }
 0x269   : > { %1947 = vmatprep.subr.bf16.mxu0 %v2130_v29 }
 0x26c   : > { %1948 = vmatpush3.bf16.msra.mxu0 %v2130_v29 }
 0x303   : > { %v1889_v41 = vpop.f32.mrf.mxu0 }
 0x304   : > { %v1059_v8 = vadd.f32 %v1889_v41, %v1693_v1 }
 0x305   : > { %v1050_v0 = vpop.f32.mrf.mxu0 }
 0x306   : > { %v1051_v5 = vadd.f32 %v1693_v1, %v1050_v0  ;;  %v1115_v24 = vmax.f32 %v1059_v8, 0.0 }
 0x307   : > { %v1890_v2 = vpop.f32.mrf.mxu0 }
 0x308   : > { %v1062_v6 = vadd.f32 %v1890_v2, %v1693_v1  ;;  %v1113_v22 = vmax.f32 %v1051_v5, 0.0 }
 0x309   : > { %v1053_v9 = vpop.f32.mrf.mxu0 }
 0x30a   : > { %v1054_v12 = vadd.f32 %v1693_v1, %v1053_v9  ;;  %v1116_v13 = vmax.f32 %v1062_v6, 0.0 }
 0x30b   : > { %v1893_v21 = vpop.f32.mrf.mxu0 }
 0x30c   : > { %v1114_v23 = vmax.f32 %v1054_v12, 0.0  ;;  %v1130_v27 = vpack.c.bf16 %v1116_v13, %v1115_v24  ;;  %v1075_v37 = vadd.f32 %v1893_v21, %v1693_v1 }
 0x30d   : > { %v1066_v25 = vpop.f32.mrf.mxu0 }
 0x30e   : > { %v1129_v26 = vpack.c.bf16 %v1114_v23, %v1113_v22  ;;  %v1067_v30 = vadd.f32 %v1693_v1, %v1066_v25  ;;  %v1119_v38 = vmax.f32 %v1075_v37, 0.0 }
 0x30f   : > { %v1894_v28 = vpop.f32.mrf.mxu0 }
 0x310   : > { %v1078_v33 = vadd.f32 %v1894_v28, %v1693_v1  ;;  %1919 = vmatprep.mubr.bf16.mxu1 %v1129_v26  ;;  %v1117_v14 = vmax.f32 %v1067_v30, 0.0 }
 0x311   : > { %v1069_v32 = vpop.f32.mrf.mxu0  ;;  %1920 = vmatmul.mubr.bf16.vlgmr.msra.gmra.mxu1 %v1130_v27 }
 0x312   : > { %v1070_v34 = vadd.f32 %v1693_v1, %v1069_v32  ;;  %1975 = vmatpush3.bf16.msra.mxu1 %v2124_v36  ;;  %v1120_v39 = vmax.f32 %v1078_v33, 0.0  ;;  %v2131_v36 = vld [vmem:[#allocation11] sm:$0xff]  }
 0x313   : > { %v1897_v4 = vpop.f32.mrf.mxu0  ;;  %1968 = vmatprep.subr.bf16.mxu1 %v2125_v63  ;;  %1949 = vmatprep.subr.bf16.mxu0 %v2131_v36 }
 0x314   : > { %v1118_v35 = vmax.f32 %v1070_v34, 0.0  ;;  %v1132_v44 = vpack.c.bf16 %v1120_v39, %v1119_v38  ;;  %v1091_v48 = vadd.f32 %v1897_v4, %v1693_v1  ;;  %1950 = vmatpush3.bf16.msra.mxu0 %v2131_v36 }
 0x315   : > { %v1082_v42 = vpop.f32.mrf.mxu0 }
 0x316   : > { %v1131_v43 = vpack.c.bf16 %v1118_v35, %v1117_v14  ;;  %1976 = vmatpush3.bf16.msra.mxu1 %v2125_v63  ;;  %v1083_v46 = vadd.f32 %v1693_v1, %v1082_v42  ;;  %v1123_v56 = vmax.f32 %v1091_v48, 0.0 }
 0x317   : > { %v1898_v45 = vpop.f32.mrf.mxu0  ;;  %1969 = vmatprep.subr.bf16.mxu1 %v2126_v19 }
 0x318   : > { %v1094_v47 = vadd.f32 %v1898_v45, %v1693_v1  ;;  %1923 = vmatprep.mubr.bf16.mxu1 %v1131_v43  ;;  %v1121_v16 = vmax.f32 %v1083_v46, 0.0 }
 0x319   : > { %v1085_v49 = vpop.f32.mrf.mxu0  ;;  %1924 = vmatmul.mubr.bf16.gmra.mxu1 %v1132_v44 }
 0x31a   : > { %v1086_v52 = vadd.f32 %v1693_v1, %v1085_v49  ;;  %1977 = vmatpush3.bf16.msra.mxu1 %v2126_v19  ;;  %v1124_v50 = vmax.f32 %v1094_v47, 0.0 }
 0x31b   : > { %v1901_v15 = vpop.f32.mrf.mxu0  ;;  %1970 = vmatprep.subr.bf16.mxu1 %v2127_v20 }
 0x31c   : > { %v1122_v55 = vmax.f32 %v1086_v52, 0.0  ;;  %v1134_v31 = vpack.c.bf16 %v1124_v50, %v1123_v56  ;;  %v1107_v59 = vadd.f32 %v1901_v15, %v1693_v1 }
 0x31d   : > { %v1098_v51 = vpop.f32.mrf.mxu0 }
 0x31e   : > { %v1133_v53 = vpack.c.bf16 %v1122_v55, %v1121_v16  ;;  %1978 = vmatpush3.bf16.msra.mxu1 %v2127_v20  ;;  %v1099_v57 = vadd.f32 %v1693_v1, %v1098_v51  ;;  %v1127_v11 = vmax.f32 %v1107_v59, 0.0  ;;  %v1702_v20 = vld [vmem:[%s2877_s8] ss:$0 sm:$0xff] }
 0x31f   : > { %v1902_v54 = vpop.f32.mrf.mxu0  ;;  %1971 = vmatprep.subr.bf16.mxu1 %v2785_v40 }
 0x320   : > { %v1110_v58 = vadd.f32 %v1902_v54, %v1693_v1  ;;  %1927 = vmatprep.mubr.bf16.mxu1 %v1133_v53  ;;  %v1125_v18 = vmax.f32 %v1099_v57, 0.0 }
 0x321   : > { %v1101_v3 = vpop.f32.mrf.mxu0  ;;  %1928 = vmatmul.mubr.bf16.gmra.mxu1 %v1134_v31 }
 0x322   : > { %v1102_v7 = vadd.f32 %v1693_v1, %v1101_v3  ;;  %1979 = vmatpush3.bf16.msra.mxu1 %v2785_v40  ;;  %v1128_v17 = vmax.f32 %v1110_v58, 0.0 }
 0x323   : > { %1972 = vmatprep.subr.bf16.mxu1 %v2129_v62 }
 0x324   : > { %v1126_v10 = vmax.f32 %v1102_v7, 0.0  ;;  %v1136_v61 = vpack.c.bf16 %v1128_v17, %v1127_v11 }
 0x326   : > { %v1135_v60 = vpack.c.bf16 %v1126_v10, %v1125_v18  ;;  %1980 = vmatpush3.bf16.msra.mxu1 %v2129_v62  ;;  %v1711_v10 = vld [vmem:[%s2879_s10] ss:$0 sm:$0xff] }
 0x327   : > { %1973 = vmatprep.subr.bf16.mxu1 %v2130_v29 }
 0x328   : > { %1931 = vmatprep.mubr.bf16.mxu1 %v1135_v60 }
 0x329   : > { %1932 = vmatmul.mubr.bf16.gmra.mxu1 %v1136_v61 }
 0x32a   : > { %1981 = vmatpush3.bf16.msra.mxu1 %v2130_v29 }
 0x32b   : > { %1974 = vmatprep.subr.bf16.mxu1 %v2131_v36 }
 0x32e   : > { %1982 = vmatpush3.bf16.msra.mxu1 %v2131_v36 }
 0x3d1   : > { %v1921_v63 = vpop.f32.mrf.mxu1 }
 0x3d2   : > { %v1251_v1 = vadd.f32 %v1921_v63, %v1702_v20 }
 0x3d3   : > { %v1242_v19 = vpop.f32.mrf.mxu1 }
 0x3d4   : > { %v1243_v41 = vadd.f32 %v1702_v20, %v1242_v19  ;;  %v1307_v13 = vmax.f32 %v1251_v1, 0.0 }
 0x3d5   : > { %v1922_v40 = vpop.f32.mrf.mxu1 }
 0x3d6   : > { %v1254_v0 = vadd.f32 %v1922_v40, %v1702_v20  ;;  %v1305_v9 = vmax.f32 %v1243_v41, 0.0 }
 0x3d7   : > { %v1245_v2 = vpop.f32.mrf.mxu1 }
 0x3d8   : > { %v1246_v5 = vadd.f32 %v1702_v20, %v1245_v2  ;;  %v1308_v6 = vmax.f32 %v1254_v0, 0.0 }
 0x3d9   : > { %v1925_v8 = vpop.f32.mrf.mxu1 }
 0x3da   : > { %v1306_v12 = vmax.f32 %v1246_v5, 0.0  ;;  %v1322_v23 = vpack.c.bf16 %v1308_v6, %v1307_v13  ;;  %v1267_v27 = vadd.f32 %v1925_v8, %v1702_v20 }
 0x3db   : > { %v1258_v21 = vpop.f32.mrf.mxu1 }
 0x3dc   : > { %v1321_v22 = vpack.c.bf16 %v1306_v12, %v1305_v9  ;;  %v1259_v25 = vadd.f32 %v1702_v20, %v1258_v21  ;;  %v1311_v39 = vmax.f32 %v1267_v27, 0.0 }
 0x3dd   : > { %v1926_v24 = vpop.f32.mrf.mxu1 }
 0x3de   : > { %v1270_v26 = vadd.f32 %v1926_v24, %v1702_v20  ;;  %1951 = vmatprep.mubr.bf16.mxu0 %v1321_v22  ;;  %v1309_v32 = vmax.f32 %v1259_v25, 0.0 }
 0x3df   : > { %v1261_v28 = vpop.f32.mrf.mxu1  ;;  %1952 = vmatmul.mubr.bf16.vlgmr.msra.gmra.mxu0 %v1322_v23 }
 0x3e0   : > { %v1262_v30 = vadd.f32 %v1702_v20, %v1261_v28  ;;  %v1312_v33 = vmax.f32 %v1270_v26, 0.0 }
 0x3e1   : > { %v1929_v37 = vpop.f32.mrf.mxu1 }
 0x3e2   : > { %v1310_v34 = vmax.f32 %v1262_v30, 0.0  ;;  %v1324_v35 = vpack.c.bf16 %v1312_v33, %v1311_v39  ;;  %v1283_v44 = vadd.f32 %v1929_v37, %v1702_v20 }
 0x3e3   : > { %v1274_v4 = vpop.f32.mrf.mxu1 }
 0x3e4   : > { %v1323_v14 = vpack.c.bf16 %v1310_v34, %v1309_v32  ;;  %v1275_v42 = vadd.f32 %v1702_v20, %v1274_v4  ;;  %v1315_v50 = vmax.f32 %v1283_v44, 0.0 }
 0x3e5   : > { %v1930_v38 = vpop.f32.mrf.mxu1 }
 0x3e6   : > { %v1286_v43 = vadd.f32 %v1930_v38, %v1702_v20  ;;  %1955 = vmatprep.mubr.bf16.mxu0 %v1323_v14  ;;  %v1313_v49 = vmax.f32 %v1275_v42, 0.0 }
 0x3e7   : > { %v1277_v45 = vpop.f32.mrf.mxu1  ;;  %1956 = vmatmul.mubr.bf16.gmra.mxu0 %v1324_v35 }
 0x3e8   : > { %v1278_v46 = vadd.f32 %v1702_v20, %v1277_v45  ;;  %v1316_v47 = vmax.f32 %v1286_v43, 0.0 }
 0x3e9   : > { %v1933_v48 = vpop.f32.mrf.mxu1 }
 0x3ea   : > { %v1314_v52 = vmax.f32 %v1278_v46, 0.0  ;;  %v1326_v55 = vpack.c.bf16 %v1316_v47, %v1315_v50  ;;  %v1299_v31 = vadd.f32 %v1933_v48, %v1702_v20 }
 0x3eb   : > { %v1290_v15 = vpop.f32.mrf.mxu1 }
 0x3ec   : > { %v1325_v16 = vpack.c.bf16 %v1314_v52, %v1313_v49  ;;  %v1291_v51 = vadd.f32 %v1702_v20, %v1290_v15  ;;  %v1319_v7 = vmax.f32 %v1299_v31, 0.0 }
 0x3ed   : > { %v1934_v56 = vpop.f32.mrf.mxu1 }
 0x3ee   : > { %v1302_v53 = vadd.f32 %v1934_v56, %v1702_v20  ;;  %1959 = vmatprep.mubr.bf16.mxu1 %v1325_v16  ;;  %v1317_v59 = vmax.f32 %v1291_v51, 0.0 }
 0x3ef   : > { %v1293_v54 = vpop.f32.mrf.mxu1  ;;  %1960 = vmatmul.mubr.bf16.vlgmr.msra.gmra.mxu1 %v1326_v55 }
 0x3f0   : > { %v1294_v57 = vadd.f32 %v1702_v20, %v1293_v54  ;;  %v1320_v58 = vmax.f32 %v1302_v53, 0.0 }
 0x3f2   : > { %v1318_v3 = vmax.f32 %v1294_v57, 0.0  ;;  %v1328_v18 = vpack.c.bf16 %v1320_v58, %v1319_v7 }
 0x3f4   : > { %v1327_v17 = vpack.c.bf16 %v1318_v3, %v1317_v59 }
 0x3f6   : > { %1963 = vmatprep.mubr.bf16.mxu1 %v1327_v17 }
 0x3f7   : > { %1964 = vmatmul.mubr.bf16.gmra.mxu1 %v1328_v18 }
 0x49f   : > { %v1953_v11 = vpop.f32.mrf.mxu0 }
 0x4a0   : > { %v1443_v60 = vadd.f32 %v1953_v11, %v1711_v10 }
 0x4a1   : > { %v1434_v61 = vpop.f32.mrf.mxu0 }
 0x4a2   : > { %1499 = vst [vmem:[%s2801_s9 + $0x10] sm:$0xff] %v1443_v60  ;;  %v1435_v62 = vadd.f32 %v1711_v10, %v1434_v61 }
 0x4a3   : > { %v1954_v29 = vpop.f32.mrf.mxu0 }
 0x4a4   : > { %1497 = vst [vmem:[%s2801_s9] sm:$0xff] %v1435_v62  ;;  %v1446_v36 = vadd.f32 %v1954_v29, %v1711_v10 }
 0x4a5   : > { %v1437_v63 = vpop.f32.mrf.mxu0 }
 0x4a6   : > { %1500 = vst [vmem:[%s2801_s9 + $0x18] sm:$0xff] %v1446_v36  ;;  %v1438_v19 = vadd.f32 %v1711_v10, %v1437_v63 }
 0x4a7   : > { %v1957_v20 = vpop.f32.mrf.mxu0 }
 0x4a8   : > { %1498 = vst [vmem:[%s2801_s9 + $0x8] sm:$0xff] %v1438_v19  ;;  %v1459_v40 = vadd.f32 %v1957_v20, %v1711_v10 }
 0x4a9   : > { %v1450_v41 = vpop.f32.mrf.mxu0 }
 0x4aa   : > { %1503 = vst [vmem:[%s2801_s9 + $0x30] sm:$0xff] %v1459_v40  ;;  %v1451_v0 = vadd.f32 %v1711_v10, %v1450_v41 }
 0x4ab   : > { %v1958_v1 = vpop.f32.mrf.mxu0 }
 0x4ac   : > { %1501 = vst [vmem:[%s2801_s9 + $0x20] sm:$0xff] %v1451_v0  ;;  %v1462_v2 = vadd.f32 %v1958_v1, %v1711_v10 }
 0x4ad   : > { %v1453_v5 = vpop.f32.mrf.mxu0 }
 0x4ae   : > { %1504 = vst [vmem:[%s2801_s9 + $0x38] sm:$0xff] %v1462_v2  ;;  %v1454_v6 = vadd.f32 %v1711_v10, %v1453_v5 }
 0x4af   : > { %v1961_v8 = vpop.f32.mrf.mxu1 }
 0x4b0   : > { %1502 = vst [vmem:[%s2801_s9 + $0x28] sm:$0xff] %v1454_v6  ;;  %v1475_v9 = vadd.f32 %v1961_v8, %v1711_v10 }
 0x4b1   : > { %v1466_v12 = vpop.f32.mrf.mxu1 }
 0x4b2   : > { %1507 = vst [vmem:[%s2801_s9 + $0x50] sm:$0xff] %v1475_v9  ;;  %v1467_v13 = vadd.f32 %v1711_v10, %v1466_v12 }
 0x4b3   : > { %v1962_v21 = vpop.f32.mrf.mxu1 }
 0x4b4   : > { %1505 = vst [vmem:[%s2801_s9 + $0x40] sm:$0xff] %v1467_v13  ;;  %v1478_v22 = vadd.f32 %v1962_v21, %v1711_v10 }
 0x4b5   : > { %v1469_v23 = vpop.f32.mrf.mxu1 }
 0x4b6   : > { %1508 = vst [vmem:[%s2801_s9 + $0x58] sm:$0xff] %v1478_v22  ;;  %v1470_v24 = vadd.f32 %v1711_v10, %v1469_v23 }
 0x4b7   : > { %v1965_v25 = vpop.f32.mrf.mxu1 }
 0x4b8   : > { %1506 = vst [vmem:[%s2801_s9 + $0x48] sm:$0xff] %v1470_v24  ;;  %v1491_v26 = vadd.f32 %v1965_v25, %v1711_v10 }
 0x4b9   : > { %v1482_v27 = vpop.f32.mrf.mxu1 }
 0x4ba   : > { %1511 = vst [vmem:[%s2801_s9 + $0x70] sm:$0xff] %v1491_v26  ;;  %v1483_v28 = vadd.f32 %v1711_v10, %v1482_v27 }
 0x4bb   : > { %v1966_v30 = vpop.f32.mrf.mxu1 }
 0x4bc   : > { %1509 = vst [vmem:[%s2801_s9 + $0x60] sm:$0xff] %v1483_v28  ;;  %v1494_v33 = vadd.f32 %v1966_v30, %v1711_v10 }
 0x4bd   : > { %v1485_v37 = vpop.f32.mrf.mxu1 }
 0x4be   : > { %1512 = vst [vmem:[%s2801_s9 + $0x78] sm:$0xff] %v1494_v33  ;;  %v1486_v32 = vadd.f32 %v1711_v10, %v1485_v37 }
 0x4c0   : > { %1510 = vst [vmem:[%s2801_s9 + $0x68] sm:$0xff] %v1486_v32 }
 0x4c1   : > { %2311 = shalt.err (!%p2308_p3)
}
 0x4c2   : > { %s2312_s22 = scalar_lea.hbm %s2822_s24, 2048  ;;  %s2316_s16 = scalar_lea.hbm %s2880_s11, 4096 }
 0x4c3   : > { %p2313_p4 = scmp.ne.s32.totalorder %s2822_s24, %s2312_s22  ;;  %p2317_p2 = scmp.lt.s32.totalorder %s2822_s24, %s2880_s11 }
 0x4c4   : > { %p2318_p7 = scmp.lt.s32.totalorder %s2316_s16, %s2312_s22 }
 0x4c5   : > { %p2314_p12 = pnand %p2313_p4, %p2914_p11 }
 0x4c6   : > { %p2319_p8 = por %p2318_p7, %p2317_p2 }
 0x4c7   : > { %p2315_p6 = pneg %p2314_p12 }
 0x4c9   : > { %p2320_p10 = pnand %p2319_p8, %p2315_p6 }
 0x4cb   : > { %2323 = shalt.err (!%p2320_p10)
}
 0x4cc   : > { %s2385_s1 = smov 128   ;;  %s2386_s3 = smov 8  }
 0x4cd   : > { %2005 = dma.vmem_to_hbm [thread:$0]  (%p2914_p11), %s2824_s14, 2048, %s2822_s24, %s1514_s13, %s2385_s1, %s2385_s1, %s2386_s3  }
 0x4ce PF: > { %s1542_s23 = sand.u32 1, %s2362_s17   ;;  %p2915_p0 = scmp.ne.s32.totalorder %s2902_s12, 0 }
 0x4cf   : > { %p2916_p13 = scmp.ge.s32.totalorder %s2374_s20, 2  ;;  %s1543_s29 = scalar_lea.sflag [#allocation4], %s1542_s23 }
 0x4d1   : > { %p2028_p5 = pnand %p2916_p13, %p2915_p0 }
 0x4d3   : > { %p2029_p9 = pneg %p2028_p5 }
 0x4d5   : > { %2357 = dma.done.wait (%p2029_p9), %s1543_s29, 2048  }
 0x4d6   : > { %2359 = vsyncadd (%p2029_p9), %s1543_s29, 4294965248  ;;  %p27_p1 = scmp.ge.s32.totalorder %s2558_s30, 4   ;;  %s2917_s17 = smov %s2366_s18 }
 0x4d7   : > { %s2918_s18 = smov %s2370_s19  ;;  %s2919_s19 = smov %s2570_s28 }
 0x4d8   : > { %s2920_s20 = smov %s2558_s30  ;;  %29 = sbr.rel (!%p27_p1) target bundleno = 14 (0xe), region = 129 }
 0x4dd   :  { %1548 = vsyncpa [#allocation3], 1 }
 0x4de   :  { %1550 = vsyncpa [#allocation3 + $0x1], 1 }
 0x4df   :  { %1551 = vsyncpa [#allocation6], 1 }
 0x4e0   :  { %1552 = vsyncpa [#allocation9], 1 }
 0x4e1   :  { %1553 = vsyncpa [#allocation12], 1 }
 0x4e2   :  { %1554 = vsyncpa [#allocation4], 1 }
 0x4e3   :  { %1556 = vsyncpa [#allocation4 + $0x1], 1 }

</bundles_post_ra>
